<compile_context>
chip_gen: v7x
topology: tpu7x:2x2x1
jax: 0.10.0
libtpu: 0.0.40
codegen_flags: <defaults>
</compile_context>

<pallas_src>
import functools

import jax
import jax.numpy as jnp
from jax import lax
from jax.experimental import pallas as pl
from jax.experimental.pallas import tpu as pltpu


# ----------------------------------------------------------------------------
# Shared per-step stack update (pure VPU / XLU / EUP, lane-dense (B, D*W)).
#   y    : (B, DW) fused pre-activations; lanes [0, W) = stack-input layer,
#          lanes [W, W+3) = control logits, rest zero.
#   prev : (B, DW) flattened (depth-major) stack.
# ----------------------------------------------------------------------------
def _stack_step(y, prev, stack_width):
    W = stack_width
    B, DW = prev.shape

    # --- 3-way softmax in broadcast form (no cross-lane reduce) -------------
    l0 = y[:, W:W + 1]          # push logit   (B, 1)
    l1 = y[:, W + 1:W + 2]      # pop logit    (B, 1)
    l2 = y[:, W + 2:W + 3]      # no-op logit  (B, 1)
    m = jnp.maximum(l0, jnp.maximum(l1, l2))
    e0 = jnp.broadcast_to(jnp.exp(l0 - m), (B, DW))
    e1 = jnp.broadcast_to(jnp.exp(l1 - m), (B, DW))
    e2 = jnp.broadcast_to(jnp.exp(l2 - m), (B, DW))
    # exact reciprocal (approx=True does not hold the 1e-5 tolerance)
    inv = pl.reciprocal(e0 + e1 + e2, approx=False)
    a_push = e0 * inv
    a_pop = e1 * inv
    # a_no_op = 1 - a_push - a_pop  (softmax sums to one) -> folded into blend

    # --- shifted stacks via XLU lane rolls + lane masks ----------------------
    lane = lax.broadcasted_iota(jnp.int32, (B, DW), 1)
    s_in = jnp.tanh(y)                                   # only lanes [0, W) used

    # push: new value at depth 0, everything one slot deeper.
    up_rolled = pltpu.roll(prev, shift=W, axis=1)
    stack_up = jnp.where(lane < W, s_in, up_rolled)

    # pop: everything one slot shallower, zeros at the bottom.
    down_rolled = pltpu.roll(prev, shift=DW - W, axis=1)  # == roll by -W
    stack_down = jnp.where(lane < DW - W, down_rolled, 0.0)

    return prev + a_push * (stack_up - prev) + a_pop * (stack_down - prev)


# ----------------------------------------------------------------------------
# Single-step kernel (matches StackAugmentation.forward).
# ----------------------------------------------------------------------------
def stack_step_kernel(x_ref, prev_ref, w_ref, b_ref, out_ref, *, stack_width):
    # one fused, lane-dense MXU pass for both Linear layers
    y = jnp.dot(x_ref[...], w_ref[...],
                preferred_element_type=jnp.float32) + b_ref[...]
    out_ref[...] = _stack_step(y, prev_ref[...], stack_width)


# ----------------------------------------------------------------------------
# Fused-T recurrent rollout kernel: grid=(T,), stack resident in the output
# block, pure VPU/XLU per-step body (all matmuls done up front in the wrapper).
# ----------------------------------------------------------------------------
def stack_rollout_kernel(y_ref, init_ref, out_ref, *, stack_width):
    t = pl.program_id(0)

    @pl.when(t == 0)
    def _():
        out_ref[...] = init_ref[...]

    out_ref[...] = _stack_step(y_ref[0], out_ref[...], stack_width)


# ----------------------------------------------------------------------------
# One-time parameter packing (hoisted out of the per-call path).
# ----------------------------------------------------------------------------
def pack_params(w_ctrl, b_ctrl, w_in, b_in, stack_depth):
    """Fuse the two tiny Linear layers into one lane-dense (F, D*W) weight."""
    F_in, W = w_in.shape
    DW = stack_depth * W
    assert DW >= W + 3, "need D*W >= W+3 to pack control logits next to s_in"
    pad = DW - (W + 3)
    w_fused = jnp.concatenate(
        [w_in.astype(jnp.float32), w_ctrl.astype(jnp.float32),
         jnp.zeros((F_in, pad), jnp.float32)], axis=1)
    b_fused = jnp.concatenate(
        [b_in.reshape(1, -1).astype(jnp.float32),
         b_ctrl.reshape(1, -1).astype(jnp.float32),
         jnp.zeros((1, pad), jnp.float32)], axis=1)
    return w_fused, b_fused


# ----------------------------------------------------------------------------
# Wrappers
# ----------------------------------------------------------------------------
@functools.partial(jax.jit, static_argnames=("stack_width",))
def stack_augmentation_forward(input_val, prev_stack, w_fused, b_fused, *, stack_width):
    """input_val: (1, B, F); prev_stack: (B, D, W). Returns new stack (B, D, W)."""
    x = input_val[0]                       # squeeze(0), as in PyTorch
    B, D, W = prev_stack.shape
    DW = D * W
    prev_flat = prev_stack.reshape(B, DW)  # depth-major, contiguous

    vmem = pl.BlockSpec(memory_space=pltpu.MemorySpace.VMEM)
    out_flat = pl.pallas_call(
        functools.partial(stack_step_kernel, stack_width=stack_width),
        out_shape=jax.ShapeDtypeStruct((B, DW), jnp.float32),
        in_specs=[vmem] * 4,
        out_specs=vmem,
    )(x, prev_flat, w_fused, b_fused)
    return out_flat.reshape(B, D, W)


@functools.partial(jax.jit, static_argnames=("stack_width",))
def stack_augmentation_rollout(x_seq, init_stack, w_fused, b_fused, *, stack_width):
    """x_seq: (T, B, F); init_stack: (B, D, W). Returns final stack (B, D, W)."""
    T, B, F_in = x_seq.shape
    _, D, W = init_stack.shape
    DW = D * W

    # One MXU-filling matmul for all T steps (y_t does not depend on state).
    y_all = (jnp.dot(x_seq.reshape(T * B, F_in), w_fused,
                     preferred_element_type=jnp.float32)
             + b_fused).reshape(T, B, DW)
    init_flat = init_stack.reshape(B, DW)

    out_flat = pl.pallas_call(
        functools.partial(stack_rollout_kernel, stack_width=stack_width),
        out_shape=jax.ShapeDtypeStruct((B, DW), jnp.float32),
        grid=(T,),
        in_specs=[pl.BlockSpec((1, B, DW), lambda t: (t, 0, 0)),
                  pl.BlockSpec((B, DW), lambda t: (0, 0))],
        out_specs=pl.BlockSpec((B, DW), lambda t: (0, 0)),
        compiler_params=pltpu.CompilerParams(
            dimension_semantics=("arbitrary",)),   # recurrent -> sequential
    )(y_all, init_flat)
    return out_flat.reshape(B, D, W)


# ----------------------------------------------------------------------------
# Pure-JAX reference (mirrors the PyTorch module).
# ----------------------------------------------------------------------------
def reference_forward(input_val, prev_stack, w_ctrl, b_ctrl, w_in, b_in):
    x = input_val[0]
    B, D, W = prev_stack.shape
    controls = jax.nn.softmax(x @ w_ctrl + b_ctrl[0], axis=1)            # (B, 3)
    s_in = jnp.tanh(x @ w_in + b_in[0])                                  # (B, W)
    zeros_bottom = jnp.zeros((B, 1, W), dtype=prev_stack.dtype)
    stack_down = jnp.concatenate([prev_stack[:, 1:], zeros_bottom], axis=1)
    stack_up = jnp.concatenate([s_in[:, None, :], prev_stack[:, :-1]], axis=1)
    a_push = controls[:, 0][:, None, None]
    a_pop = controls[:, 1][:, None, None]
    a_no_op = controls[:, 2][:, None, None]
    return a_no_op * prev_stack + a_push * stack_up + a_pop * stack_down


if __name__ == "__main__":
    # Small, deterministic problem sizes consistent with the module.
    B = 8            # batch (multiple of 8 -> full sublane utilization)
    F = 32           # in_features
    D = 8            # stack_depth
    W = 16           # stack_width   (D * W = 128 -> exactly one lane row)
    T = 4            # timesteps for the fused recurrent rollout

    key = jax.random.PRNGKey(0)
    k1, k2, k3, k4, k5, k6, k7 = jax.random.split(key, 7)

    # Deterministic parameter init (PyTorch-Linear-like uniform bounds).
    bound_c = 1.0 / jnp.sqrt(F)
    w_ctrl = jax.random.uniform(k1, (F, 3), jnp.float32, -bound_c, bound_c)
    b_ctrl = jax.random.uniform(k2, (1, 3), jnp.float32, -bound_c, bound_c)
    w_in = jax.random.uniform(k3, (F, W), jnp.float32, -bound_c, bound_c)
    b_in = jax.random.uniform(k4, (1, W), jnp.float32, -bound_c, bound_c)

    # Parameter packing is done ONCE here (hoisted out of the forward path).
    w_fused, b_fused = pack_params(w_ctrl, b_ctrl, w_in, b_in, D)

    # Example inputs.
    input_val = jax.random.normal(k5, (1, B, F), jnp.float32)
    prev_stack = jax.random.normal(k6, (B, D, W), jnp.float32)
    x_seq = jax.random.normal(k7, (T, B, F), jnp.float32)

    # ---- single step (the module's forward) --------------------------------
    ref = reference_forward(input_val, prev_stack, w_ctrl, b_ctrl, w_in, b_in)
    out = stack_augmentation_forward(input_val, prev_stack, w_fused, b_fused,
                                     stack_width=W)
    out = jax.block_until_ready(out)
    assert out.shape == (B, D, W)
    assert jnp.allclose(out, ref, atol=1e-5, rtol=1e-5), "single-step mismatch"

    # ---- fused-T recurrent rollout ------------------------------------------
    ref_stack = prev_stack
    for t in range(T):
        ref_stack = reference_forward(x_seq[t:t + 1].reshape(1, B, F) * 0 + x_seq[t][None],
                                      ref_stack, w_ctrl, b_ctrl, w_in, b_in)
    out_roll = stack_augmentation_rollout(x_seq, prev_stack, w_fused, b_fused,
                                          stack_width=W)
    out_roll = jax.block_until_ready(out_roll)
    assert out_roll.shape == (B, D, W)
    assert jnp.allclose(out_roll, ref_stack, atol=2e-5, rtol=1e-4), "rollout mismatch"

    print("KERNEL_OK")
</pallas_src>

<mosaic_0001>
module attributes {stable_mosaic.version = 11 : i64} {
  func.func @stack_step_kernel(%arg0: memref<8x32xf32, #tpu.memory_space<vmem>>, %arg1: memref<8x128xf32, #tpu.memory_space<vmem>>, %arg2: memref<32x128xf32, #tpu.memory_space<vmem>>, %arg3: memref<1x128xf32, #tpu.memory_space<vmem>>, %arg4: memref<8x128xf32, #tpu.memory_space<vmem>>) attributes {dimension_semantics = [], scalar_prefetch = 0 : i64, scratch_operands = 0 : i64, tpu.core_type = #tpu.core_type<tc>} {
    %c0 = arith.constant 0 : index
    %c0_0 = arith.constant 0 : index
    %0 = vector.load %arg0[%c0, %c0_0] : memref<8x32xf32, #tpu.memory_space<vmem>>, vector<8x32xf32>
    %c0_1 = arith.constant 0 : index
    %c0_2 = arith.constant 0 : index
    %1 = vector.load %arg2[%c0_1, %c0_2] : memref<32x128xf32, #tpu.memory_space<vmem>>, vector<32x128xf32>
    %cst = arith.constant dense<0.000000e+00> : vector<8x128xf32>
    %2 = tpu.matmul %0, %1, %cst {dimension_numbers = #tpu.dot_dimension_numbers<[1], [0], [0], [1], [0, 0, 1, 1], [], []>} : vector<8x32xf32>, vector<32x128xf32>, vector<8x128xf32> -> vector<8x128xf32>
    %c0_3 = arith.constant 0 : index
    %c0_4 = arith.constant 0 : index
    %3 = vector.load %arg3[%c0_3, %c0_4] : memref<1x128xf32, #tpu.memory_space<vmem>>, vector<1x128xf32>
    %4 = vector.broadcast %3 : vector<1x128xf32> to vector<8x128xf32>
    %5 = arith.addf %2, %4 : vector<8x128xf32>
    %c0_5 = arith.constant 0 : index
    %c0_6 = arith.constant 0 : index
    %6 = vector.load %arg1[%c0_5, %c0_6] : memref<8x128xf32, #tpu.memory_space<vmem>>, vector<8x128xf32>
    %7 = vector.extract_strided_slice %5 {offsets = [0, 16], sizes = [8, 1], strides = [1, 1]} : vector<8x128xf32> to vector<8x1xf32>
    %8 = vector.extract_strided_slice %5 {offsets = [0, 17], sizes = [8, 1], strides = [1, 1]} : vector<8x128xf32> to vector<8x1xf32>
    %9 = vector.extract_strided_slice %5 {offsets = [0, 18], sizes = [8, 1], strides = [1, 1]} : vector<8x128xf32> to vector<8x1xf32>
    %10 = arith.maximumf %8, %9 : vector<8x1xf32>
    %11 = arith.maximumf %7, %10 : vector<8x1xf32>
    %12 = arith.subf %7, %11 : vector<8x1xf32>
    %13 = math.exp %12 : vector<8x1xf32>
    %14 = vector.shape_cast %13 : vector<8x1xf32> to vector<8x1xf32>
    %15 = vector.broadcast %14 : vector<8x1xf32> to vector<8x128xf32>
    %16 = arith.subf %8, %11 : vector<8x1xf32>
    %17 = math.exp %16 : vector<8x1xf32>
    %18 = vector.shape_cast %17 : vector<8x1xf32> to vector<8x1xf32>
    %19 = vector.broadcast %18 : vector<8x1xf32> to vector<8x128xf32>
    %20 = arith.subf %9, %11 : vector<8x1xf32>
    %21 = math.exp %20 : vector<8x1xf32>
    %22 = vector.shape_cast %21 : vector<8x1xf32> to vector<8x1xf32>
    %23 = vector.broadcast %22 : vector<8x1xf32> to vector<8x128xf32>
    %24 = arith.addf %15, %19 : vector<8x128xf32>
    %25 = arith.addf %24, %23 : vector<8x128xf32>
    %26 = tpu.reciprocal %25 : vector<8x128xf32> -> vector<8x128xf32>
    %27 = arith.mulf %15, %26 : vector<8x128xf32>
    %28 = arith.mulf %19, %26 : vector<8x128xf32>
    %29 = tpu.iota {dimensions = array<i32: 1>} : vector<8x128xi32>
    %30 = math.tanh %5 : vector<8x128xf32>
    %c16_i32 = arith.constant 16 : i32
    %31 = tpu.dynamic_rotate %6 by %c16_i32 dim 1 : vector<8x128xf32>, i32 -> vector<8x128xf32>
    %c16_i32_7 = arith.constant 16 : i32
    %32 = vector.broadcast %c16_i32_7 : i32 to vector<8x128xi32>
    %33 = arith.cmpi slt, %29, %32 : vector<8x128xi32>
    %34 = arith.select %33, %30, %31 : vector<8x128xi1>, vector<8x128xf32>
    %c112_i32 = arith.constant 112 : i32
    %35 = tpu.dynamic_rotate %6 by %c112_i32 dim 1 : vector<8x128xf32>, i32 -> vector<8x128xf32>
    %c112_i32_8 = arith.constant 112 : i32
    %36 = vector.broadcast %c112_i32_8 : i32 to vector<8x128xi32>
    %37 = arith.cmpi slt, %29, %36 : vector<8x128xi32>
    %cst_9 = arith.constant 0.000000e+00 : f32
    %38 = vector.broadcast %cst_9 : f32 to vector<8x128xf32>
    %39 = arith.select %37, %35, %38 : vector<8x128xi1>, vector<8x128xf32>
    %40 = arith.subf %34, %6 : vector<8x128xf32>
    %41 = arith.mulf %27, %40 : vector<8x128xf32>
    %42 = arith.addf %6, %41 : vector<8x128xf32>
    %43 = arith.subf %39, %6 : vector<8x128xf32>
    %44 = arith.mulf %28, %43 : vector<8x128xf32>
    %45 = arith.addf %42, %44 : vector<8x128xf32>
    %c0_10 = arith.constant 0 : index
    %c0_11 = arith.constant 0 : index
    %46 = vector.load %arg4[%c0_10, %c0_11] : memref<8x128xf32, #tpu.memory_space<vmem>>, vector<8x128xf32>
    tpu.vector_store %arg4[%c0_10, %c0_11], %45 {strides = array<i32>} : memref<8x128xf32, #tpu.memory_space<vmem>>, vector<8x128xf32>,
    return
  }
}

</mosaic_0001>

<bundles_post_ra>
// kernel: stack_augmentation_forward.1
= control target key start
LH: loop header
LB: loop body
LE: loop exit
PB: predicated region body
PF: predicated region fallthrough
CT: control target
= control target key end

     0   :  { %v221_v0 = vmov 0.0|0.0   ;;  %vm222_vm0 = vmmov 0   ;;  %v223_v4 = vmov 0.0   ;;  %vm29_vm1 = vcmask 261120   ;;  %s224_s27 = smov 127   ;;  %s229_s29 = smov 16   ;;  %s281_s2 = inlined_call_operand.vmem [shape: f32[32,128], index: 2, kind: input, shape index: {}]   ;;  %s282_s0 = inlined_call_operand.vmem [shape: f32[8,32], index: 0, kind: input, shape index: {}]   ;;  %s283_s3 = inlined_call_operand.vmem [shape: f32[1,128], index: 3, kind: input, shape index: {}]   ;;  %s284_s1 = inlined_call_operand.vmem [shape: f32[8,128], index: 1, kind: input, shape index: {}]   ;;  %s285_s4 = inlined_call_operand.vmem [shape: f32[8,128], index: 4, kind: output, shape index: {}]  }
   0x1   :  { %190 = vmatprep.subr.bf16.mxu0 %v221_v0  ;;  %v18_v1 = vld [vmem:[%s281_s2] sm:$0xff]  ;;  %v19_v2 = vld [vmem:[%s281_s2 + $0x8] sm:$0xff]  ;;  %v20_v3 = vld [vmem:[%s281_s2 + $0x10] sm:$0xff]  ;;  %187 = vmatprep.mubr.msk.f32.mxu0 %vm222_vm0, %v223_v4  ;;  %v225_v13 = vmov 16   ;;  %v226_v16 = vmov 17   ;;  %v230_v23 = vmov 18   ;;  %v150_v35 = vlaneseq }
   0x2   :  { %v191_v5 = vpack.c.bf16 %v19_v2, %v18_v1  ;;  %v21_v6 = vld [vmem:[%s281_s2 + $0x18] sm:$0xff]  ;;  %v17_v8 = vld [vmem:[%s282_s0] sm:$0xff]  ;;  %207 = vset.pattern.permute.xlu0 %v225_v13  ;;  %208 = vset.pattern.permute.xlu1 %v226_v16  ;;  %s227_s0 = smov 1   ;;  %s228_s2 = smov 2  }
   0x3   :  { %v194_v7 = vpack.c.bf16 %v21_v6, %v20_v3  ;;  %v172_v9 = vld [vmem:[%s283_s3] ss:$0 sm:$0xff]  ;;  %s231_s30 = smov 112   ;;  %v151_v38 = vand.u32 127, %v150_v35 }
   0x4   :  { %192 = vmatpush3.bf16.msra.mxu0 %v191_v5  ;;  %v103_v22 = vld [vmem:[%s284_s1] sm:$0xff] }
   0x5   :  { %193 = vmatprep.subr.bf16.mxu0 %v221_v0  ;;  %vm155_vm2 = vcmp.lt.s32.totalorder %v151_v38, 16  ;;  %vm159_vm3 = vcmp.lt.s32.totalorder %v151_v38, 112 }
   0x8   :  { %195 = vmatpush3.bf16.msra.mxu0 %v194_v7 }
   0xb   :  { %188 = vmatmul.mubr.msk.f32.vlgmr.msra.gmra.mrb[0].mxu0 %vm29_vm1, %v17_v8 }
  0xde   :  { %v99_v10 = vpop.f32.mrb[0].mxu0 }
  0xdf   :  { %v100_v11 = vadd.f32 %v172_v9, %v99_v10  ;;  %v189_v12 = vpop.f32.mrb[1].mxu0 }
  0xe1   :  { %105 = vrot.lane.b32.xlu0 %v100_v11, %s224_s27 }
 0x153   :  { %v106_v14 = vpop.permute.xlu0 %105 }
 0x154   :  { %v108_v15 = vmax.f32 %v100_v11, %v106_v14 }
 0x156   :  { %110 = vrot.lane.b32.xlu0 %v108_v15, %s224_s27 }
 0x1c8   :  { %v111_v17 = vpop.permute.xlu0 %110 }
 0x1c9   :  { %v113_v18 = vmax.f32 %v100_v11, %v111_v17 }
 0x1cb   :  { %v114_v19 = vsub.f32 %v100_v11, %v113_v18  ;;  %123 = vrot.lane.b32.xlu1 %v113_v18, %s227_s0 }
 0x1cd   :  { %v115_v20 = vmul.f32 1.442695, %v114_v19 }
 0x1cf   :  { %211 = vpow2.f32 %v115_v20  ;;  %134 = vrot.lane.b32.xlu1 %v113_v18, %s228_s2 }
 0x1d9   :  { %v212_v21 = vpop.eup %211 }
 0x1da   :  { %119 = vperm.xlu0 %207, %v212_v21  }
 0x1de   :  { %153 = vrot.lane.b32.xlu0 %v103_v22, %s229_s29 }
 0x1df   :  { %210 = vset.pattern.permute.xlu0 %v230_v23 }
 0x23d   :  { %v124_v24 = vpop.permute.xlu1 %123 }
 0x23e   :  { %v126_v25 = vsub.f32 %v100_v11, %v124_v24 }
 0x240   :  { %v127_v26 = vmul.f32 1.442695, %v126_v25 }
 0x241   :  { %v135_v27 = vpop.permute.xlu1 %134 }
 0x242   :  { %213 = vpow2.f32 %v127_v26  ;;  %v137_v28 = vsub.f32 %v100_v11, %v135_v27 }
 0x244   :  { %v138_v29 = vmul.f32 1.442695, %v137_v28 }
 0x246   :  { %215 = vpow2.f32 %v138_v29 }
 0x247   :  { %217 = vtanh.f32 %v100_v11 }
 0x24c   :  { %v214_v30 = vpop.eup %213 }
 0x24d   :  { %131 = vperm.xlu1 %208, %v214_v30  }
 0x250   :  { %v216_v31 = vpop.eup %215 }
 0x251   :  { %209 = vset.pattern.permute.xlu1 %v230_v23  ;;  %v218_v41 = vpop.eup %217 }
 0x252   :  { %142 = vperm.xlu1 %209, %v216_v31  }
 0x256   :  { %157 = vrot.lane.b32.xlu1 %v103_v22, %s231_s30 }
 0x259   :  { %v120_v33 = vpop.permute.xlu0 %119 }
 0x25d   :  { %v154_v39 = vpop.permute.xlu0 %153 }
 0x25e   :  { %v156_v42 = vsel %vm155_vm2, %v218_v41, %v154_v39 }
 0x25f   :  { %v161_v45 = vsub.f32 %v156_v42, %v103_v22 }
 0x2cc   :  { %v132_v32 = vpop.permute.xlu1 %131 }
 0x2cd   :  { %v145_v34 = vadd.f32 %v132_v32, %v120_v33 }
 0x2d1   :  { %v143_v36 = vpop.permute.xlu1 %142 }
 0x2d2   :  { %v146_v37 = vadd.f32 %v145_v34, %v143_v36 }
 0x2d4   :  { %219 = vrcp.f32 %v146_v37 }
 0x2d5   :  { %v158_v40 = vpop.permute.xlu1 %157 }
 0x2d6   :  { %v160_v43 = vsel %vm159_vm3, %v158_v40, 0.0 }
 0x2d7   :  { %v164_v48 = vsub.f32 %v160_v43, %v103_v22 }
 0x2de   :  { %v220_v44 = vpop.eup %219 }
 0x2df   :  { %v148_v46 = vmul.f32 %v220_v44, %v120_v33  ;;  %v149_v47 = vmul.f32 %v220_v44, %v132_v32 }
 0x2e1   :  { %v162_v49 = vmul.f32 %v161_v45, %v148_v46  ;;  %v165_v51 = vmul.f32 %v164_v48, %v149_v47 }
 0x2e3   :  { %v163_v50 = vadd.f32 %v162_v49, %v103_v22 }
 0x2e5   :  { %v166_v52 = vadd.f32 %v165_v51, %v163_v50 }
 0x2e7   :  { %167 = vst [vmem:[%s285_s4] sm:$0xff] %v166_v52 }

</bundles_post_ra>
